<compile_context>
chip_gen: v7x
topology: tpu7x:2x2x1
jax: 0.10.0
libtpu: 0.0.40
codegen_flags: <defaults>
</compile_context>

<pallas_src>
import functools
import math

import jax
import jax.numpy as jnp
import numpy as np
from jax.experimental import pallas as pl
from jax.experimental.pallas import tpu as pltpu

_SPIKE_THRESH = 5.0   # LIFNodes.forward: self.s = x.ge(5)  (hard-coded in the module)
_LANE = 128
_ROW_ALIGN = 32       # int8 output packs 32 sublanes per vreg -> unmasked stores


def _lif_spike_kernel(x_ref, s_ref):
    # self.s = x.ge(5)  — compare in the input's native dtype, emit bytes.
    s_ref[...] = (x_ref[...] >= _SPIKE_THRESH).astype(s_ref.dtype)


def _cdiv(a, b):
    return -(-a // b)


def _round_up(v, m):
    return ((v + m - 1) // m) * m


def _default_block_rows():
    """Per-generation default row-block (rows of the (rows, 128) repack)."""
    try:
        kind = jax.devices()[0].device_kind.lower()
    except Exception:
        kind = ""
    if ("v6" in kind) or ("v7" in kind) or ("7x" in kind):
        # 16384 rows: 8 MiB f32 in + 2 MiB i8 out, x2 buffers = 20 MiB (<32 MiB scoped).
        return 16384
    # v5e / older: default scoped VMEM is ~16 MiB; 8192 rows -> 10 MiB of buffers.
    return 8192


def _pick_block_rows(rows, requested):
    if requested is None:
        requested = _default_block_rows()
    requested = max(_ROW_ALIGN, _round_up(int(requested), _ROW_ALIGN))
    num_blocks = _cdiv(rows, requested)
    # Balance block sizes across grid steps (even split over v7x's 2 TCs),
    # keep the block a multiple of 32 rows unless it covers the full array.
    return min(rows, _round_up(_cdiv(rows, num_blocks), _ROW_ALIGN))


@functools.partial(jax.jit, static_argnames=("block_rows", "return_bool"))
def lif_forward(x, *, block_rows=None, return_bool=False):
    """One LIFNodes.forward() step: spikes = (x >= 5).

    Args:
      x: input of shape (batch, *layer_shape), any float dtype (f32/bf16).
      block_rows: rows of the lane-dense (rows, 128) repack per grid step.
        Rounded to a multiple of 32; defaults per TPU generation.
      return_bool: if True, convert the byte spikes to bool (extra HBM pass).

    Returns:
      Spike tensor with the same shape as `x`; int8 {0,1} by default
      (the module registers `s` as a ByteTensor), bool if `return_bool`.
    """
    orig_shape = x.shape
    total = math.prod(orig_shape)

    # Lane-dense repack: view the flattened input as (rows, 128).
    xf = x.reshape(-1)                      # free for contiguous inputs
    lane_pad = (-total) % _LANE
    if lane_pad:
        # TODO(synk): only hit when the layer size isn't a multiple of 128;
        # this <128-element pad still costs one copy of the input in XLA.
        xf = jnp.pad(xf, (0, lane_pad))
    rows = (total + lane_pad) // _LANE
    x2 = xf.reshape(rows, _LANE)

    br = _pick_block_rows(rows, block_rows)
    grid = (pl.cdiv(rows, br),)             # ragged last block is masked by Pallas

    s2 = pl.pallas_call(
        _lif_spike_kernel,
        out_shape=jax.ShapeDtypeStruct((rows, _LANE), jnp.int8),
        grid=grid,
        in_specs=[pl.BlockSpec((br, _LANE), lambda i: (i, 0))],
        out_specs=pl.BlockSpec((br, _LANE), lambda i: (i, 0)),
        compiler_params=pltpu.CompilerParams(
            # Elementwise over independent rows: a parallel grid axis lets
            # v7x's two TensorCores split the work when grid > 1.
            dimension_semantics=("parallel",)),
    )(x2)

    if lane_pad:
        s = s2.reshape(-1)[:total].reshape(orig_shape)
    else:
        s = s2.reshape(orig_shape)          # free reshape, no copy
    if return_bool:
        s = s.astype(bool)                  # optional; costs one extra output pass
    return s


if __name__ == "__main__":
    # Layer shape (C, H, W) = (4, 16, 16), batch B = 2; inputs scaled so a
    # subset of neurons cross the module's fixed spike threshold of 5.
    B, C, H, W = 2, 4, 16, 16
    key = jax.random.PRNGKey(0)
    x = jax.random.uniform(key, (B, C, H, W), dtype=jnp.float32) * 10.0

    s = lif_forward(x)
    jax.block_until_ready(s)
    np.testing.assert_array_equal(np.asarray(s).astype(bool), np.asarray(x) >= _SPIKE_THRESH)
    assert s.shape == x.shape

    # bf16 input: compare runs in native dtype inside the kernel (no f32 upcast).
    x_bf16 = (jax.random.uniform(jax.random.PRNGKey(1), (B, C, H, W)) * 10.0).astype(jnp.bfloat16)
    s_bf = lif_forward(x_bf16, return_bool=True)
    jax.block_until_ready(s_bf)
    np.testing.assert_array_equal(
        np.asarray(s_bf), np.asarray(x_bf16.astype(jnp.float32)) >= _SPIKE_THRESH)
    assert s_bf.dtype == jnp.bool_

    # 128-aligned size with rows not a multiple of the block: zero-copy path,
    # multi-step grid, ragged (masked) last row-block.
    x_r = jax.random.uniform(jax.random.PRNGKey(2), (40, 128), dtype=jnp.float32) * 10.0
    s_r = lif_forward(x_r, block_rows=32)
    jax.block_until_ready(s_r)
    np.testing.assert_array_equal(np.asarray(s_r).astype(bool), np.asarray(x_r) >= _SPIKE_THRESH)

    # Size not a multiple of 128: exercises the <128-element pad path plus a
    # multi-step grid with a masked last block, and block_rows rounding.
    x_odd = jax.random.uniform(jax.random.PRNGKey(3), (3, 5, 37, 11), dtype=jnp.float32) * 10.0
    s_odd = lif_forward(x_odd, block_rows=33)
    jax.block_until_ready(s_odd)
    np.testing.assert_array_equal(np.asarray(s_odd).astype(bool), np.asarray(x_odd) >= _SPIKE_THRESH)

    print("KERNEL_OK")
</pallas_src>

<mosaic_0001>
module attributes {stable_mosaic.version = 11 : i64} {
  func.func @_lif_spike_kernel(%arg0: i32, %arg1: memref<16x128xf32, #tpu.memory_space<vmem>>, %arg2: memref<16x128xi8, #tpu.memory_space<vmem>>) attributes {dimension_semantics = [#tpu.dimension_semantics<parallel>], iteration_bounds = array<i64: 1>, scalar_prefetch = 0 : i64, scratch_operands = 0 : i64, tpu.core_type = #tpu.core_type<tc>, window_params = [{transform_indices = @transform_0, window_bounds = array<i64: 16, 128>}, {transform_indices = @transform_1, window_bounds = array<i64: 16, 128>}]} {
    %c0 = arith.constant 0 : index
    %c0_0 = arith.constant 0 : index
    %0 = vector.load %arg1[%c0, %c0_0] : memref<16x128xf32, #tpu.memory_space<vmem>>, vector<16x128xf32>
    %cst = arith.constant 5.000000e+00 : f32
    %1 = vector.broadcast %cst : f32 to vector<16x128xf32>
    %2 = arith.cmpf oge, %0, %1 : vector<16x128xf32>
    %3 = arith.extui %2 : vector<16x128xi1> to vector<16x128xi8>
    %c0_1 = arith.constant 0 : index
    %c0_2 = arith.constant 0 : index
    %4 = vector.load %arg2[%c0_1, %c0_2] : memref<16x128xi8, #tpu.memory_space<vmem>>, vector<16x128xi8>
    tpu.vector_store %arg2[%c0_1, %c0_2], %3 {strides = array<i32>} : memref<16x128xi8, #tpu.memory_space<vmem>>, vector<16x128xi8>,
    return
  }
  func.func @transform_0(%arg0: i32) -> (i32, i32) {
    %c0_i32 = arith.constant 0 : i32
    %c0_i32_0 = arith.constant 0 : i32
    return %arg0, %c0_i32 : i32, i32
  }
  func.func @transform_1(%arg0: i32) -> (i32, i32) {
    %c0_i32 = arith.constant 0 : i32
    %c0_i32_0 = arith.constant 0 : i32
    return %arg0, %c0_i32 : i32, i32
  }
}

</mosaic_0001>

<bundles_post_ra>
// kernel: lif_forward.1
= control target key start
LH: loop header
LB: loop body
LE: loop exit
PB: predicated region body
PF: predicated region fallthrough
CT: control target
= control target key end

     0   :  { %v30_v2 = vmov 0   ;;  %s53_s0 = inlined_call_operand.vmem [shape: f32[16,128], index: 0, kind: input, shape index: {}]   ;;  %s54_s1 = inlined_call_operand.vmem [shape: s8[16,128], index: 1, kind: output, shape index: {}]  }
   0x1   :  { %v10_v0 = vld [vmem:[%s53_s0] sm:$0xff]  ;;  %v11_v1 = vld [vmem:[%s53_s0 + $0x8] sm:$0xff] }
   0x2   :  { %vm12_vm0 = vcmp.ge.f32.partialorder %v10_v0, 5.0  ;;  %vm13_vm1 = vcmp.ge.f32.partialorder %v11_v1, 5.0 }
   0x3   :  { %vm14_vm2 = vmpackc.low %vm13_vm1, %vm12_vm0 }
   0x4   :  { %vm15_vm3 = vmpackc.even %vm14_vm2, %vm14_vm2 }
   0x5   :  { %v16_v3 = vsel %vm15_vm3, 16843009, %v30_v2 }
   0x6   :  { %v17_v4 = vunpack.c.0.s8 %v16_v3  ;;  %v18_v5 = vunpack.c.1.s8 %v16_v3 }
   0x8   :  { %v19_v6 = vpack.c.b16 %v17_v4, %v17_v4  ;;  %v21_v7 = vpack.c.b16 %v18_v5, %v18_v5 }
   0xa   :  { %v20_v8 = vpack.c.b8 %v19_v6, %v19_v6  ;;  %v22_v9 = vpack.c.b8 %v21_v7, %v21_v7 }
   0xc   :  { %23 = vst [vmem:[%s54_s1] sm:$0x3] %v20_v8  ;;  %24 = vst [vmem:[%s54_s1 + $0x2] sm:$0x3] %v22_v9 }

</bundles_post_ra>
